<compile_context>
chip_gen: v7x
topology: tpu7x:2x2x1
jax: 0.10.0
libtpu: 0.0.40
codegen_flags: <defaults>
</compile_context>

<pallas_src>
import functools

import jax
import jax.numpy as jnp
from jax.experimental import pallas as pl
from jax.experimental.pallas import tpu as pltpu


def _round_up(x, m):
    return ((x + m - 1) // m) * m


def _ffn_kernel(x_ref, w1_ref, b1_ref, w2_ref, b2_ref, o_ref, acc_ref):
    # x_ref:  (tm, d_model)       bf16
    # w1_ref: (d_model, tk)       bf16   (tile of W1^T along d_ffn)
    # b1_ref: (1, tk)             f32
    # w2_ref: (tk, d_model)       bf16   (tile of W2^T along d_ffn)
    # b2_ref: (1, d_model)        f32
    # o_ref:  (tm, d_model)       out dtype
    # acc_ref:(tm, d_model)       f32 VMEM accumulator (lives across k steps)
    k = pl.program_id(1)

    @pl.when(k == 0)
    def _():
        acc_ref[...] = jnp.zeros_like(acc_ref)

    # First matmul tile on the MXU, f32 accumulation.
    h = jnp.dot(x_ref[...], w1_ref[...], preferred_element_type=jnp.float32)
    h = jnp.maximum(h + b1_ref[...], 0.0)          # bias + ReLU in f32
    # Dropout: identity in eval/inference mode.
    # TODO(synk): training-mode dropout via pltpu.prng_seed / prng_random_bits.

    # Partial second matmul, accumulated over the d_ffn tiles.
    acc_ref[...] += jnp.dot(h.astype(w2_ref.dtype), w2_ref[...],
                            preferred_element_type=jnp.float32)

    @pl.when(k == pl.num_programs(1) - 1)
    def _():
        o_ref[...] = (acc_ref[...] + b2_ref[...]).astype(o_ref.dtype)


@functools.partial(jax.jit, static_argnames=("tm", "tk"))
def positionwise_ffn(x, w1t, b1, w2t, b2, *, tm=256, tk=512):
    """x: [batch, seq, d_model]; w1t: [d_model, d_ffn]; w2t: [d_ffn, d_model]."""
    batch, seq, d_model = x.shape
    d_ffn = w1t.shape[1]
    orig_dtype = x.dtype
    M = batch * seq

    # Effective tile sizes: shrink the row tile for tiny M, pad M otherwise.
    M8 = _round_up(M, 8)
    tm_eff = min(tm, M8)
    M_pad = _round_up(M8, tm_eff)
    # d_ffn tile: use tk when it divides evenly (tk is a 128-multiple),
    # otherwise fall back to the full d_ffn (small-model case).
    tk_eff = tk if (d_ffn % tk == 0) else d_ffn

    # bf16 MXU path (f32 accumulation inside the kernel); biases stay f32.
    x2d = x.reshape(M, d_model).astype(jnp.bfloat16)
    if M_pad != M:
        x2d = jnp.pad(x2d, ((0, M_pad - M), (0, 0)))
    w1b = w1t.astype(jnp.bfloat16)
    w2b = w2t.astype(jnp.bfloat16)
    b1r = b1.reshape(1, d_ffn).astype(jnp.float32)
    b2r = b2.reshape(1, d_model).astype(jnp.float32)

    grid = (M_pad // tm_eff, d_ffn // tk_eff)
    out_itemsize = jnp.dtype(orig_dtype).itemsize

    cost = pl.CostEstimate(
        flops=4 * M_pad * d_model * d_ffn,          # two matmuls
        transcendentals=0,
        bytes_accessed=(x2d.size * 2 + w1b.size * 2 + w2b.size * 2
                        + b1r.size * 4 + b2r.size * 4
                        + M_pad * d_model * out_itemsize),
    )

    out2d = pl.pallas_call(
        _ffn_kernel,
        out_shape=jax.ShapeDtypeStruct((M_pad, d_model), orig_dtype),
        grid_spec=pltpu.PrefetchScalarGridSpec(
            num_scalar_prefetch=0,
            grid=grid,
            in_specs=[
                pl.BlockSpec((tm_eff, d_model), lambda i, k: (i, 0)),   # x tile (resident over k)
                pl.BlockSpec((d_model, tk_eff), lambda i, k: (0, k)),   # W1^T d_ffn tile
                pl.BlockSpec((1, tk_eff),       lambda i, k: (0, k)),   # b1 tile
                pl.BlockSpec((tk_eff, d_model), lambda i, k: (k, 0)),   # W2^T d_ffn tile
                pl.BlockSpec((1, d_model),      lambda i, k: (0, 0)),   # b2 (grid-invariant)
            ],
            out_specs=pl.BlockSpec((tm_eff, d_model), lambda i, k: (i, 0)),
            scratch_shapes=[pltpu.VMEM((tm_eff, d_model), jnp.float32)],
        ),
        compiler_params=pltpu.CompilerParams(
            dimension_semantics=("parallel", "arbitrary"),
            vmem_limit_bytes=48 * 1024 * 1024,
        ),
        cost_estimate=cost,
    )(x2d, w1b, b1r, w2b, b2r)

    return out2d[:M].reshape(batch, seq, d_model)


if __name__ == "__main__":
    key = jax.random.PRNGKey(0)
    kx, k1, k2, k3, k4 = jax.random.split(key, 5)

    # Small but lane-friendly shapes: d_model multiple of 128 keeps output
    # stores lane-dense; d_ffn=1024 with tk=512 exercises the reduction axis.
    batch, seq, d_model, d_ffn = 2, 8, 128, 1024
    x = jax.random.normal(kx, (batch, seq, d_model), jnp.float32)

    # nn.Linear-style uniform(-1/sqrt(fan_in), 1/sqrt(fan_in)) init.
    lim1 = 1.0 / (d_model ** 0.5)
    lim2 = 1.0 / (d_ffn ** 0.5)
    w1 = jax.random.uniform(k1, (d_ffn, d_model), jnp.float32, -lim1, lim1)
    b1 = jax.random.uniform(k2, (d_ffn,), jnp.float32, -lim1, lim1)
    w2 = jax.random.uniform(k3, (d_model, d_ffn), jnp.float32, -lim2, lim2)
    b2 = jax.random.uniform(k4, (d_model,), jnp.float32, -lim2, lim2)

    # Pre-transpose ONCE outside the hot path (no per-call HBM transpose).
    w1t = jnp.asarray(w1.T)   # (d_model, d_ffn)
    w2t = jnp.asarray(w2.T)   # (d_ffn, d_model)

    out = positionwise_ffn(x, w1t, b1, w2t, b2)
    out = jax.block_until_ready(out)
    assert out.shape == (batch, seq, d_model)

    # Reference mirroring the kernel's bf16-matmul / f32-accumulate numerics.
    xb = x.astype(jnp.bfloat16).astype(jnp.float32)
    w1f = w1t.astype(jnp.bfloat16).astype(jnp.float32)
    w2f = w2t.astype(jnp.bfloat16).astype(jnp.float32)
    h = jnp.maximum(xb @ w1f + b1, 0.0)
    h = h.astype(jnp.bfloat16).astype(jnp.float32)
    ref_bf16 = h @ w2f + b2
    assert jnp.allclose(out, ref_bf16, atol=1e-2, rtol=1e-2), "mismatch vs bf16 reference"

    # Looser check against the pure-f32 PyTorch-equivalent forward (eval mode).
    ref_f32 = jnp.maximum(x @ w1.T + b1, 0.0) @ w2.T + b2
    assert jnp.allclose(out, ref_f32, atol=0.1, rtol=0.1), "mismatch vs f32 reference"

    print("KERNEL_OK")
</pallas_src>

<mosaic_0001>
module attributes {stable_mosaic.version = 11 : i64} {
  func.func @_ffn_kernel(%arg0: i32, %arg1: i32, %arg2: memref<16x128xbf16, #tpu.memory_space<vmem>>, %arg3: memref<128x512xbf16, #tpu.memory_space<vmem>>, %arg4: memref<1x512xf32, #tpu.memory_space<vmem>>, %arg5: memref<512x128xbf16, #tpu.memory_space<vmem>>, %arg6: memref<1x128xf32, #tpu.memory_space<vmem>>, %arg7: memref<16x128xf32, #tpu.memory_space<vmem>>, %arg8: memref<16x128xf32, #tpu.memory_space<vmem>>) attributes {dimension_semantics = [#tpu.dimension_semantics<parallel>, #tpu.dimension_semantics<arbitrary>], iteration_bounds = array<i64: 1, 2>, scalar_prefetch = 0 : i64, scratch_operands = 1 : i64, tpu.core_type = #tpu.core_type<tc>, window_params = [{transform_indices = @transform_0, window_bounds = array<i64: 16, 128>}, {transform_indices = @transform_1, window_bounds = array<i64: 128, 512>}, {transform_indices = @transform_2, window_bounds = array<i64: 1, 512>}, {transform_indices = @transform_3, window_bounds = array<i64: 512, 128>}, {pipeline_mode = #tpu.pipeline_mode<synchronous>, transform_indices = @transform_4, window_bounds = array<i64: 1, 128>}, {transform_indices = @transform_5, window_bounds = array<i64: 16, 128>}]} {
    %c0_i32 = arith.constant 0 : i32
    %0 = arith.cmpi eq, %arg1, %c0_i32 : i32
    %1 = arith.extui %0 : i1 to i32
    %c0_i32_0 = arith.constant 0 : i32
    %2 = arith.cmpi ne, %1, %c0_i32_0 : i32
    scf.if %2 {
      %cst_15 = arith.constant 0.000000e+00 : f32
      %20 = vector.broadcast %cst_15 : f32 to vector<16x128xf32>
      %c0_16 = arith.constant 0 : index
      %c0_17 = arith.constant 0 : index
      %21 = vector.load %arg8[%c0_16, %c0_17] : memref<16x128xf32, #tpu.memory_space<vmem>>, vector<16x128xf32>
      tpu.vector_store %arg8[%c0_16, %c0_17], %20 {strides = array<i32>} : memref<16x128xf32, #tpu.memory_space<vmem>>, vector<16x128xf32>,
    } else {
    }
    %c0 = arith.constant 0 : index
    %c0_1 = arith.constant 0 : index
    %3 = vector.load %arg2[%c0, %c0_1] : memref<16x128xbf16, #tpu.memory_space<vmem>>, vector<16x128xbf16>
    %c0_2 = arith.constant 0 : index
    %c0_3 = arith.constant 0 : index
    %4 = vector.load %arg3[%c0_2, %c0_3] : memref<128x512xbf16, #tpu.memory_space<vmem>>, vector<128x512xbf16>
    %cst = arith.constant dense<0.000000e+00> : vector<16x512xf32>
    %5 = tpu.matmul %3, %4, %cst {dimension_numbers = #tpu.dot_dimension_numbers<[1], [0], [0], [1], [0, 0, 1, 1], [], []>} : vector<16x128xbf16>, vector<128x512xbf16>, vector<16x512xf32> -> vector<16x512xf32>
    %c0_4 = arith.constant 0 : index
    %c0_5 = arith.constant 0 : index
    %6 = vector.load %arg4[%c0_4, %c0_5] : memref<1x512xf32, #tpu.memory_space<vmem>>, vector<1x512xf32>
    %7 = vector.broadcast %6 : vector<1x512xf32> to vector<16x512xf32>
    %8 = arith.addf %5, %7 : vector<16x512xf32>
    %cst_6 = arith.constant 0.000000e+00 : f32
    %9 = vector.broadcast %cst_6 : f32 to vector<16x512xf32>
    %10 = arith.maximumf %8, %9 : vector<16x512xf32>
    %c0_7 = arith.constant 0 : index
    %c0_8 = arith.constant 0 : index
    %11 = vector.load %arg8[%c0_7, %c0_8] : memref<16x128xf32, #tpu.memory_space<vmem>>, vector<16x128xf32>
    %12 = arith.truncf %10 : vector<16x512xf32> to vector<16x512xbf16>
    %c0_9 = arith.constant 0 : index
    %c0_10 = arith.constant 0 : index
    %13 = vector.load %arg5[%c0_9, %c0_10] : memref<512x128xbf16, #tpu.memory_space<vmem>>, vector<512x128xbf16>
    %cst_11 = arith.constant dense<0.000000e+00> : vector<16x128xf32>
    %14 = tpu.matmul %12, %13, %cst_11 {dimension_numbers = #tpu.dot_dimension_numbers<[1], [0], [0], [1], [0, 0, 1, 1], [], []>} : vector<16x512xbf16>, vector<512x128xbf16>, vector<16x128xf32> -> vector<16x128xf32>
    %15 = arith.addf %11, %14 : vector<16x128xf32>
    %c0_12 = arith.constant 0 : index
    %c0_13 = arith.constant 0 : index
    %16 = vector.load %arg8[%c0_12, %c0_13] : memref<16x128xf32, #tpu.memory_space<vmem>>, vector<16x128xf32>
    tpu.vector_store %arg8[%c0_12, %c0_13], %15 {strides = array<i32>} : memref<16x128xf32, #tpu.memory_space<vmem>>, vector<16x128xf32>,
    %c1_i32 = arith.constant 1 : i32
    %17 = arith.cmpi eq, %arg1, %c1_i32 : i32
    %18 = arith.extui %17 : i1 to i32
    %c0_i32_14 = arith.constant 0 : i32
    %19 = arith.cmpi ne, %18, %c0_i32_14 : i32
    scf.if %19 {
      %c0_15 = arith.constant 0 : index
      %c0_16 = arith.constant 0 : index
      %20 = vector.load %arg8[%c0_15, %c0_16] : memref<16x128xf32, #tpu.memory_space<vmem>>, vector<16x128xf32>
      %c0_17 = arith.constant 0 : index
      %c0_18 = arith.constant 0 : index
      %21 = vector.load %arg6[%c0_17, %c0_18] : memref<1x128xf32, #tpu.memory_space<vmem>>, vector<1x128xf32>
      %22 = vector.broadcast %21 : vector<1x128xf32> to vector<16x128xf32>
      %23 = arith.addf %20, %22 : vector<16x128xf32>
      %c0_19 = arith.constant 0 : index
      %c0_20 = arith.constant 0 : index
      %24 = vector.load %arg7[%c0_19, %c0_20] : memref<16x128xf32, #tpu.memory_space<vmem>>, vector<16x128xf32>
      tpu.vector_store %arg7[%c0_19, %c0_20], %23 {strides = array<i32>} : memref<16x128xf32, #tpu.memory_space<vmem>>, vector<16x128xf32>,
    } else {
    }
    return
  }
  func.func @transform_0(%arg0: i32, %arg1: i32) -> (i32, i32) {
    %c0_i32 = arith.constant 0 : i32
    %c0_i32_0 = arith.constant 0 : i32
    return %arg0, %c0_i32 : i32, i32
  }
  func.func @transform_1(%arg0: i32, %arg1: i32) -> (i32, i32) {
    %c0_i32 = arith.constant 0 : i32
    %c0_i32_0 = arith.constant 0 : i32
    return %c0_i32, %arg1 : i32, i32
  }
  func.func @transform_2(%arg0: i32, %arg1: i32) -> (i32, i32) {
    %c0_i32 = arith.constant 0 : i32
    %c0_i32_0 = arith.constant 0 : i32
    return %c0_i32, %arg1 : i32, i32
  }
  func.func @transform_3(%arg0: i32, %arg1: i32) -> (i32, i32) {
    %c0_i32 = arith.constant 0 : i32
    %c0_i32_0 = arith.constant 0 : i32
    return %arg1, %c0_i32 : i32, i32
  }
  func.func @transform_4(%arg0: i32, %arg1: i32) -> (i32, i32) {
    %c0_i32 = arith.constant 0 : i32
    %c0_i32_0 = arith.constant 0 : i32
    %c0_i32_1 = arith.constant 0 : i32
    return %c0_i32, %c0_i32_0 : i32, i32
  }
  func.func @transform_5(%arg0: i32, %arg1: i32) -> (i32, i32) {
    %c0_i32 = arith.constant 0 : i32
    %c0_i32_0 = arith.constant 0 : i32
    return %arg0, %c0_i32 : i32, i32
  }
}

</mosaic_0001>

<bundles_post_ra>
// kernel: positionwise_ffn.1
= control target key start
LH: loop header
LB: loop body
LE: loop exit
PB: predicated region body
PF: predicated region fallthrough
CT: control target
= control target key end

     0   :  { %10 = vsyncpa [#allocation5], 0  ;;  %s1533_s18 = smov 0   ;;  %s1535_s19 = smov 0   ;;  %s1783_s0 = inlined_call_operand.vmem [shape: bf16[16,128], index: 0, kind: input, shape index: {}]   ;;  %s1784_s1 = inlined_call_operand.vmem [shape: bf16[128,1024], index: 1, kind: input, shape index: {}]   ;;  %s1785_s2 = inlined_call_operand.vmem [shape: f32[1,1024], index: 2, kind: input, shape index: {}]   ;;  %s1786_s3 = inlined_call_operand.vmem [shape: bf16[1024,128], index: 3, kind: input, shape index: {}]   ;;  %s1787_s4 = inlined_call_operand.vmem [shape: f32[1,128], index: 4, kind: input, shape index: {}]   ;;  %s1788_s5 = inlined_call_operand.hbm [shape: f32[16,128], index: 5, kind: output, shape index: {}]  }
   0x1   :  { %s1537_s20 = smov 0   ;;  %s1539_s21 = smov 0  }
   0x2   :  { %s1541_s22 = smov 0  }
   0x3 LB: > { %s1167_s23 = sadd.s32 4294967295, %s1496_s22   ;;  %s25_s24 = sadd.s32 1, %s1492_s21  ;;  %s1496_s22 = sphi %s1541_s22, %s16_s22   ;;  %s1492_s21 = sphi %s1539_s21, %s1793_s21   ;;  %s1488_s20 = sphi %s1537_s20, %s1792_s20   ;;  %s1484_s19 = sphi %s1535_s19, %s1791_s19   ;;  %s1480_s18 = sphi %s1533_s18, %s1790_s18  }
   0x4   : > { %p26_p0 = scmp.ge.s32.totalorder %s25_s24, 2  ;;  %p68_p1 = scmp.ne.s32.totalorder %s1484_s19, %s1480_s18 }
   0x5   : > { %p69_p2 = scmp.eq.s32.totalorder %s1496_s22, 0  ;;  %s61_s26 = sadd.s32 1, %s1484_s19 }
   0x6   : > { %s1795_s24 = smov (%p26_p0, %s25_s24), 0  ;;  %p1170_p5 = scmp.ge.s32.totalorder %s1496_s22, 2 }
   0x7   : > { %p70_p3 = por %p69_p2, %p68_p1  ;;  %s58_s25 = ssub.s32 %s1492_s21, %s1795_s24 }
   0x8   : > { %p59_p4 = scmp.eq.s32.totalorder %s58_s25, 0  ;;  %205 = sbr.rel (%p1170_p5) target bundleno = 35 (0x23), region = 24 }
   0xa   : > { %s1569_s27 = scalar_select %p59_p4, %s1484_s19, %s61_s26  }
   0xf   : > { %208 = sbr.rel (!%p70_p3) target bundleno = 35 (0x23), region = 28  ;;  %s210_s28 = sand.u32 (%p70_p3), 1, %s1484_s19  }
  0x10   : > { %s1251_s29 = sshll.u32 (%p70_p3), %s1492_s21, 4  ;;  %s1171_s30 = sshll.u32 (%p70_p3), %s210_s28, 8 }
  0x11   : > { %s1577_s8 = scalar_lea.vmem (%p70_p3), %s1784_s1, %s1251_s29  ;;  %s1582_s9 = scalar_lea.vmem (%p70_p3), [#allocation3], %s1171_s30 }
  0x12   : > { %v228_v0 = vld [vmem:[%s1577_s8] sm:$0xff] (%p70_p3)  ;;  %v230_v1 = vld [vmem:[%s1577_s8 + $0x8] sm:$0xff] (%p70_p3) }
  0x13   : > { %v232_v2 = vld [vmem:[%s1577_s8 + $0x20] sm:$0xff] (%p70_p3)  ;;  %229 = vst [vmem:[%s1582_s9] sm:$0xff] (%p70_p3), %v228_v0  ;;  %231 = vst [vmem:[%s1582_s9 + $0x8] sm:$0xff] (%p70_p3), %v230_v1  ;;  %v234_v3 = vld [vmem:[%s1577_s8 + $0x28] sm:$0xff] (%p70_p3) }
  0x14   : > { %233 = vst [vmem:[%s1582_s9 + $0x10] sm:$0xff] (%p70_p3), %v232_v2  ;;  %v236_v4 = vld [vmem:[%s1577_s8 + $0x40] sm:$0xff] (%p70_p3)  ;;  %v238_v5 = vld [vmem:[%s1577_s8 + $0x48] sm:$0xff] (%p70_p3)  ;;  %235 = vst [vmem:[%s1582_s9 + $0x18] sm:$0xff] (%p70_p3), %v234_v3 }
  0x15   : > { %237 = vst [vmem:[%s1582_s9 + $0x20] sm:$0xff] (%p70_p3), %v236_v4  ;;  %239 = vst [vmem:[%s1582_s9 + $0x28] sm:$0xff] (%p70_p3), %v238_v5  ;;  %v240_v6 = vld [vmem:[%s1577_s8 + $0x60] sm:$0xff] (%p70_p3)  ;;  %v242_v7 = vld [vmem:[%s1577_s8 + $0x68] sm:$0xff] (%p70_p3) }
  0x16   : > { %v244_v8 = vld [vmem:[%s1577_s8 + $0x80] sm:$0xff]  ;;  %241 = vst [vmem:[%s1582_s9 + $0x30] sm:$0xff] %v240_v6  ;;  %243 = vst [vmem:[%s1582_s9 + $0x38] sm:$0xff] %v242_v7  ;;  %v246_v9 = vld [vmem:[%s1577_s8 + $0x88] sm:$0xff] }
  0x17   : > { %245 = vst [vmem:[%s1582_s9 + $0x40] sm:$0xff] %v244_v8  ;;  %v248_v10 = vld [vmem:[%s1577_s8 + $0xa0] sm:$0xff]  ;;  %v250_v11 = vld [vmem:[%s1577_s8 + $0xa8] sm:$0xff]  ;;  %247 = vst [vmem:[%s1582_s9 + $0x48] sm:$0xff] %v246_v9 }
  0x18   : > { %249 = vst [vmem:[%s1582_s9 + $0x50] sm:$0xff] %v248_v10  ;;  %251 = vst [vmem:[%s1582_s9 + $0x58] sm:$0xff] %v250_v11  ;;  %v252_v12 = vld [vmem:[%s1577_s8 + $0xc0] sm:$0xff]  ;;  %v254_v13 = vld [vmem:[%s1577_s8 + $0xc8] sm:$0xff] }
  0x19   : > { %v256_v14 = vld [vmem:[%s1577_s8 + $0xe0] sm:$0xff]  ;;  %253 = vst [vmem:[%s1582_s9 + $0x60] sm:$0xff] %v252_v12  ;;  %255 = vst [vmem:[%s1582_s9 + $0x68] sm:$0xff] %v254_v13  ;;  %v258_v15 = vld [vmem:[%s1577_s8 + $0xe8] sm:$0xff] }
  0x1a   : > { %257 = vst [vmem:[%s1582_s9 + $0x70] sm:$0xff] %v256_v14  ;;  %v260_v16 = vld [vmem:[%s1577_s8 + $0x100] sm:$0xff]  ;;  %v262_v17 = vld [vmem:[%s1577_s8 + $0x108] sm:$0xff]  ;;  %259 = vst [vmem:[%s1582_s9 + $0x78] sm:$0xff] %v258_v15 }
  0x1b   : > { %261 = vst [vmem:[%s1582_s9 + $0x80] sm:$0xff] %v260_v16  ;;  %263 = vst [vmem:[%s1582_s9 + $0x88] sm:$0xff] %v262_v17  ;;  %v264_v18 = vld [vmem:[%s1577_s8 + $0x120] sm:$0xff]  ;;  %v266_v19 = vld [vmem:[%s1577_s8 + $0x128] sm:$0xff] }
  0x1c   : > { %v268_v20 = vld [vmem:[%s1577_s8 + $0x140] sm:$0xff]  ;;  %265 = vst [vmem:[%s1582_s9 + $0x90] sm:$0xff] %v264_v18  ;;  %267 = vst [vmem:[%s1582_s9 + $0x98] sm:$0xff] %v266_v19  ;;  %v270_v21 = vld [vmem:[%s1577_s8 + $0x148] sm:$0xff] }
  0x1d   : > { %269 = vst [vmem:[%s1582_s9 + $0xa0] sm:$0xff] %v268_v20  ;;  %v272_v22 = vld [vmem:[%s1577_s8 + $0x160] sm:$0xff]  ;;  %v274_v23 = vld [vmem:[%s1577_s8 + $0x168] sm:$0xff]  ;;  %271 = vst [vmem:[%s1582_s9 + $0xa8] sm:$0xff] %v270_v21 }
  0x1e   : > { %273 = vst [vmem:[%s1582_s9 + $0xb0] sm:$0xff] %v272_v22  ;;  %275 = vst [vmem:[%s1582_s9 + $0xb8] sm:$0xff] %v274_v23  ;;  %v276_v24 = vld [vmem:[%s1577_s8 + $0x180] sm:$0xff]  ;;  %v278_v25 = vld [vmem:[%s1577_s8 + $0x188] sm:$0xff] }
  0x1f   : > { %v280_v26 = vld [vmem:[%s1577_s8 + $0x1a0] sm:$0xff]  ;;  %277 = vst [vmem:[%s1582_s9 + $0xc0] sm:$0xff] %v276_v24  ;;  %279 = vst [vmem:[%s1582_s9 + $0xc8] sm:$0xff] %v278_v25  ;;  %v282_v27 = vld [vmem:[%s1577_s8 + $0x1a8] sm:$0xff] }
  0x20   : > { %281 = vst [vmem:[%s1582_s9 + $0xd0] sm:$0xff] %v280_v26  ;;  %v284_v28 = vld [vmem:[%s1577_s8 + $0x1c0] sm:$0xff]  ;;  %v286_v29 = vld [vmem:[%s1577_s8 + $0x1c8] sm:$0xff]  ;;  %283 = vst [vmem:[%s1582_s9 + $0xd8] sm:$0xff] %v282_v27 }
  0x21   : > { %285 = vst [vmem:[%s1582_s9 + $0xe0] sm:$0xff] %v284_v28  ;;  %287 = vst [vmem:[%s1582_s9 + $0xe8] sm:$0xff] %v286_v29  ;;  %v288_v30 = vld [vmem:[%s1577_s8 + $0x1e0] sm:$0xff]  ;;  %v290_v31 = vld [vmem:[%s1577_s8 + $0x1e8] sm:$0xff] }
  0x22   : > { %289 = vst [vmem:[%s1582_s9 + $0xf0] sm:$0xff] %v288_v30  ;;  %291 = vst [vmem:[%s1582_s9 + $0xf8] sm:$0xff] %v290_v31 }
  0x23 PF: > { %p1174_p6 = scmp.ge.s32.totalorder %s1496_s22, 1  ;;  %p313_p7 = scmp.lt.s32.totalorder %s1496_s22, 3 }
  0x25   : > { %p314_p8 = pnand %p1174_p6, %p313_p7 }
  0x26   : > { %s320_s10 = sand.u32 (!%p314_p8), 1, %s1480_s18   ;;  %s1176_s11 = sshll.u32 (!%p314_p8), %s1488_s20, 2 }
  0x27   : > { %317 = sbr.rel (%p314_p8) target bundleno = 569 (0x239), region = 59  ;;  %s1175_s12 = sshll.u32 (!%p314_p8), %s320_s10, 8 }
  0x28   : > { %p364_p9 = scmp.lt.s32.totalorder (!%p314_p8), %s1176_s11, 7  ;;  %s1177_s13 = sshll.u32 (!%p314_p8), %s1488_s20, 6 }
  0x29   : > { %p369_p10 = scmp.lt.s32.totalorder (!%p314_p8), %s1177_s13, 127  ;;  %s1661_s18 = scalar_lea.vmem (!%p314_p8), [#allocation3], %s1175_s12 }
  0x2a   : > { %p1179_p11 = scmp.ne.s32.totalorder (!%p314_p8), %s1488_s20, 0 }
  0x2e   : > { %s1797_s11 = smov (!%p364_p9, %s1176_s11), 7  ;;  %s1799_s13 = smov (!%p369_p10, %s1177_s13), 127 }
  0x2f   : > { %s366_s16 = scalar_lea.vmem %s1785_s2, %s1797_s11  ;;  %s1178_s17 = sshll.u32 %s1799_s13, 2  ;;  %v1498_v32 = vmov (!%p1179_p11), 0.0  }
  0x30   : > { %s1659_s28 = scalar_lea.vmem %s1786_s3, %s1178_s17  ;;  %379 = sbr.rel (%p1179_p11) target bundleno = 55 (0x37), region = 67  ;;  %380 = vst [vmem:[#allocation2] sm:$0xff] (!%p1179_p11), %v1498_v32  ;;  %381 = vst [vmem:[#allocation2 + $0x8] sm:$0xff] (!%p1179_p11), %v1498_v32 }
  0x37 PF: > { %v1347_v33 = vld [vmem:[%s1661_s18 + $0x4] ss:$16 sps:$4 sm:$0xff]   ;;  %v1349_v34 = vld [vmem:[%s1661_s18 + $0xc] ss:$16 sps:$4 sm:$0xff]   ;;  %v1499_v35 = vmov 0   ;;  %p1245_p12 = scmp.ne.s32.totalorder %s1488_s20, 1 }
  0x38   : > { %636 = vmatprep.mubr.bf16.mxu0 %v1499_v35  ;;  %679 = vmatprep.mubr.bf16.mxu1 %v1499_v35  ;;  %v1351_v36 = vld [vmem:[%s1661_s18] ss:$16 sps:$4 sm:$0xff]   ;;  %v1352_v37 = vld [vmem:[%s1661_s18 + $0x8] ss:$16 sps:$4 sm:$0xff]   ;;  %v1353_v38 = vld [vmem:[%s1661_s18 + $0x24] ss:$16 sps:$4 sm:$0xff]   ;;  %v418_v35 = vlaneseq }
  0x39   : > { %604 = vmatprep.subr.bf16.mxu0 %v1347_v33  ;;  %647 = vmatprep.subr.bf16.mxu1 %v1349_v34  ;;  %v1355_v39 = vld [vmem:[%s1661_s18 + $0x2c] ss:$16 sps:$4 sm:$0xff]   ;;  %v1357_v40 = vld [vmem:[%s1661_s18 + $0x20] ss:$16 sps:$4 sm:$0xff]   ;;  %v1358_v41 = vld [vmem:[%s1661_s18 + $0x28] ss:$16 sps:$4 sm:$0xff]  }
  0x3a   : > { %605 = vmatpush1.bf16.msra.mxu0 %v1351_v36  ;;  %648 = vmatpush1.bf16.msra.mxu1 %v1352_v37  ;;  %v1359_v42 = vld [vmem:[%s1661_s18 + $0x44] ss:$16 sps:$4 sm:$0xff]   ;;  %v1361_v43 = vld [vmem:[%s1661_s18 + $0x4c] ss:$16 sps:$4 sm:$0xff]   ;;  %v1363_v44 = vld [vmem:[%s1661_s18 + $0x40] ss:$16 sps:$4 sm:$0xff]  }
  0x3b   : > { %606 = vmatprep.subr.bf16.mxu0 %v1353_v38  ;;  %649 = vmatprep.subr.bf16.mxu1 %v1355_v39  ;;  %v1364_v45 = vld [vmem:[%s1661_s18 + $0x48] ss:$16 sps:$4 sm:$0xff]   ;;  %v1365_v46 = vld [vmem:[%s1661_s18 + $0x64] ss:$16 sps:$4 sm:$0xff]   ;;  %v1367_v47 = vld [vmem:[%s1661_s18 + $0x6c] ss:$16 sps:$4 sm:$0xff]  }
  0x3c   : > { %v1369_v48 = vld [vmem:[%s1661_s18 + $0x60] ss:$16 sps:$4 sm:$0xff]   ;;  %v1370_v49 = vld [vmem:[%s1661_s18 + $0x68] ss:$16 sps:$4 sm:$0xff]   ;;  %v1371_v50 = vld [vmem:[%s1661_s18 + $0x84] ss:$16 sps:$4 sm:$0xff]  }
  0x3d   : > { %v1373_v51 = vld [vmem:[%s1661_s18 + $0x8c] ss:$16 sps:$4 sm:$0xff]   ;;  %v1375_v52 = vld [vmem:[%s1661_s18 + $0x80] ss:$16 sps:$4 sm:$0xff]   ;;  %v1376_v53 = vld [vmem:[%s1661_s18 + $0x88] ss:$16 sps:$4 sm:$0xff]  }
  0x3e   : > { %607 = vmatpush1.bf16.msra.mxu0 %v1357_v40  ;;  %650 = vmatpush1.bf16.msra.mxu1 %v1358_v41  ;;  %v1377_v54 = vld [vmem:[%s1661_s18 + $0xa4] ss:$16 sps:$4 sm:$0xff]   ;;  %v1379_v55 = vld [vmem:[%s1661_s18 + $0xac] ss:$16 sps:$4 sm:$0xff]   ;;  %v1381_v56 = vld [vmem:[%s1661_s18 + $0xa0] ss:$16 sps:$4 sm:$0xff]  }
  0x3f   : > { %608 = vmatprep.subr.bf16.mxu0 %v1359_v42  ;;  %651 = vmatprep.subr.bf16.mxu1 %v1361_v43  ;;  %v1382_v57 = vld [vmem:[%s1661_s18 + $0xa8] ss:$16 sps:$4 sm:$0xff]   ;;  %v1383_v58 = vld [vmem:[%s1661_s18 + $0xc4] ss:$16 sps:$4 sm:$0xff]   ;;  %v1385_v59 = vld [vmem:[%s1661_s18 + $0xcc] ss:$16 sps:$4 sm:$0xff]  }
  0x40   : > { %v1387_v60 = vld [vmem:[%s1661_s18 + $0xc0] ss:$16 sps:$4 sm:$0xff]   ;;  %v1388_v61 = vld [vmem:[%s1661_s18 + $0xc8] ss:$16 sps:$4 sm:$0xff]   ;;  %v1389_v62 = vld [vmem:[%s1661_s18 + $0xe4] ss:$16 sps:$4 sm:$0xff]  }
  0x41   : > { %v1391_v63 = vld [vmem:[%s1661_s18 + $0xec] ss:$16 sps:$4 sm:$0xff]   ;;  %v1393_v0 = vld [vmem:[%s1661_s18 + $0xe0] ss:$16 sps:$4 sm:$0xff]   ;;  %v1394_v1 = vld [vmem:[%s1661_s18 + $0xe8] ss:$16 sps:$4 sm:$0xff]  }
  0x42   : > { %609 = vmatpush1.bf16.msra.mxu0 %v1363_v44  ;;  %652 = vmatpush1.bf16.msra.mxu1 %v1364_v45  ;;  %v1396_v2 = vld [vmem:[%s1659_s28 + $0x40] sm:$0xff]   ;;  %v1400_v7 = vld [vmem:[%s1659_s28 + $0x48] sm:$0xff]   ;;  %v1404_v11 = vld [vmem:[%s1659_s28 + $0x50] sm:$0xff]   ;;  %v419_v36 = vshrl.u32 %v418_v35, 7 }
  0x43   : > { %610 = vmatprep.subr.bf16.mxu0 %v1365_v46  ;;  %653 = vmatprep.subr.bf16.mxu1 %v1367_v47  ;;  %v1395_v3 = vld [vmem:[%s1783_s0] sm:$0xff]   ;;  %v1401_v8 = vld [vmem:[%s1659_s28 + $0xc8] sm:$0xff]   ;;  %v1405_v12 = vld [vmem:[%s1659_s28 + $0xd0] sm:$0xff]  }
  0x44   : > { %v1397_v4 = vld [vmem:[%s1659_s28 + $0xc0] sm:$0xff]   ;;  %v1402_v9 = vld [vmem:[%s1659_s28 + $0x8] sm:$0xff]   ;;  %v1406_v13 = vld [vmem:[%s1659_s28 + $0x10] sm:$0xff]   ;;  %v420_v37 = vsub.s32 0, %v419_v36  ;;  %v428_v38 = vsub.s32 2, %v419_v36  ;;  %v424_v40 = vsub.s32 1, %v419_v36 }
  0x45   : > { %v1398_v5 = vld [vmem:[%s1659_s28] sm:$0xff]   ;;  %v1403_v10 = vld [vmem:[%s1659_s28 + $0x88] sm:$0xff]   ;;  %v1407_v14 = vld [vmem:[%s1659_s28 + $0x90] sm:$0xff]   ;;  %v432_v41 = vsub.s32 3, %v419_v36 }
  0x46   : > { %611 = vmatpush1.bf16.msra.mxu0 %v1369_v48  ;;  %654 = vmatpush1.bf16.msra.mxu1 %v1370_v49  ;;  %v1399_v6 = vld [vmem:[%s1659_s28 + $0x80] sm:$0xff]   ;;  %v1408_v15 = vld [vmem:[%s1659_s28 + $0x58] sm:$0xff]   ;;  %v1416_v23 = vld [vmem:[%s1659_s28 + $0x68] sm:$0xff]  }
  0x47   : > { %612 = vmatprep.subr.bf16.mxu0 %v1371_v50  ;;  %655 = vmatprep.subr.bf16.mxu1 %v1373_v51  ;;  %v1409_v16 = vld [vmem:[%s1659_s28 + $0xd8] sm:$0xff]   ;;  %v1412_v19 = vld [vmem:[%s1659_s28 + $0x60] sm:$0xff]   ;;  %v1417_v24 = vld [vmem:[%s1659_s28 + $0xe8] sm:$0xff]  }
  0x48   : > { %v1410_v17 = vld [vmem:[%s1659_s28 + $0x18] sm:$0xff]   ;;  %v1413_v20 = vld [vmem:[%s1659_s28 + $0xe0] sm:$0xff]   ;;  %v1418_v25 = vld [vmem:[%s1659_s28 + $0x28] sm:$0xff]  }
  0x49   : > { %v1411_v18 = vld [vmem:[%s1659_s28 + $0x98] sm:$0xff]   ;;  %v1414_v21 = vld [vmem:[%s1659_s28 + $0x20] sm:$0xff]   ;;  %v1419_v26 = vld [vmem:[%s1659_s28 + $0xa8] sm:$0xff]  }
  0x4a   : > { %613 = vmatpush1.bf16.msra.mxu0 %v1375_v52  ;;  %656 = vmatpush1.bf16.msra.mxu1 %v1376_v53  ;;  %v1415_v22 = vld [vmem:[%s1659_s28 + $0xa0] sm:$0xff]   ;;  %v1420_v27 = vld [vmem:[%s1659_s28 + $0x70] sm:$0xff]   ;;  %v1424_v31 = vld [vmem:[%s1659_s28 + $0x78] sm:$0xff]  }
  0x4b   : > { %614 = vmatprep.subr.bf16.mxu0 %v1377_v54  ;;  %657 = vmatprep.subr.bf16.mxu1 %v1379_v55  ;;  %v1421_v28 = vld [vmem:[%s1659_s28 + $0xf0] sm:$0xff]   ;;  %v1425_v32 = vld [vmem:[%s1659_s28 + $0xf8] sm:$0xff]   ;;  %v416_v39 = vld [vmem:[%s366_s16] sm:$0xf] }
  0x4c   : > { %v1422_v29 = vld [vmem:[%s1659_s28 + $0x30] sm:$0xff]   ;;  %v1426_v33 = vld [vmem:[%s1659_s28 + $0x38] sm:$0xff]   ;;  %v421_v42 = vrot.slane %v416_v39, %v420_v37  ;;  %v429_v43 = vrot.slane %v416_v39, %v428_v38  ;;  %v425_v44 = vrot.slane %v416_v39, %v424_v40  ;;  %v433_v45 = vrot.slane %v416_v39, %v432_v41 }
  0x4d   : > { %v1423_v30 = vld [vmem:[%s1659_s28 + $0xb0] sm:$0xff]   ;;  %v1427_v34 = vld [vmem:[%s1659_s28 + $0xb8] sm:$0xff]  }
  0x4e   : > { %615 = vmatpush1.bf16.msra.mxu0 %v1381_v56  ;;  %658 = vmatpush1.bf16.msra.mxu1 %v1382_v57 }
  0x4f   : > { %616 = vmatprep.subr.bf16.mxu0 %v1383_v58  ;;  %659 = vmatprep.subr.bf16.mxu1 %v1385_v59 }
  0x52   : > { %617 = vmatpush1.bf16.msra.mxu0 %v1387_v60  ;;  %660 = vmatpush1.bf16.msra.mxu1 %v1388_v61 }
  0x53   : > { %618 = vmatprep.subr.bf16.mxu0 %v1389_v62  ;;  %661 = vmatprep.subr.bf16.mxu1 %v1391_v63 }
  0x56   : > { %619 = vmatpush1.bf16.msra.mxu0 %v1393_v0  ;;  %662 = vmatpush1.bf16.msra.mxu1 %v1394_v1 }
  0x57   : > { %1252 = vmatprep.subr.bf16.mxu0 %v1396_v2  ;;  %1274 = vmatprep.subr.bf16.mxu1 %v1397_v4 }
  0x59   : > { %637 = vmatmul.mubr.bf16.vlgmr.msra.gmra.mrb[0].mxu0 %v1395_v3  ;;  %680 = vmatmul.mubr.bf16.vlgmr.msra.gmra.mrb[0].mxu1 %v1395_v3 }
  0x5a   : > { %1253 = vmatpush3.bf16.msra.mxu0 %v1398_v5  ;;  %1275 = vmatpush3.bf16.msra.mxu1 %v1399_v6 }
  0x5b   : > { %1254 = vmatprep.subr.bf16.mxu0 %v1400_v7  ;;  %1276 = vmatprep.subr.bf16.mxu1 %v1401_v8 }
  0x5e   : > { %1255 = vmatpush3.bf16.msra.mxu0 %v1402_v9  ;;  %1277 = vmatpush3.bf16.msra.mxu1 %v1403_v10 }
  0x5f   : > { %1256 = vmatprep.subr.bf16.mxu0 %v1404_v11  ;;  %1278 = vmatprep.subr.bf16.mxu1 %v1405_v12 }
  0x62   : > { %1257 = vmatpush3.bf16.msra.mxu0 %v1406_v13  ;;  %1279 = vmatpush3.bf16.msra.mxu1 %v1407_v14 }
  0x63   : > { %1258 = vmatprep.subr.bf16.mxu0 %v1408_v15  ;;  %1280 = vmatprep.subr.bf16.mxu1 %v1409_v16 }
  0x66   : > { %1259 = vmatpush3.bf16.msra.mxu0 %v1410_v17  ;;  %1281 = vmatpush3.bf16.msra.mxu1 %v1411_v18  ;;  %v698_v18 = vld [vmem:[#allocation2] sm:$0xff] }
  0x67   : > { %1260 = vmatprep.subr.bf16.mxu0 %v1412_v19  ;;  %1282 = vmatprep.subr.bf16.mxu1 %v1413_v20 }
  0x6a   : > { %1261 = vmatpush3.bf16.msra.mxu0 %v1414_v21  ;;  %1283 = vmatpush3.bf16.msra.mxu1 %v1415_v22 }
  0x6b   : > { %1262 = vmatprep.subr.bf16.mxu0 %v1416_v23  ;;  %1284 = vmatprep.subr.bf16.mxu1 %v1417_v24  ;;  %v699_v24 = vld [vmem:[#allocation2 + $0x8] sm:$0xff] }
  0x6e   : > { %1263 = vmatpush3.bf16.msra.mxu0 %v1418_v25  ;;  %1285 = vmatpush3.bf16.msra.mxu1 %v1419_v26 }
  0x6f   : > { %1264 = vmatprep.subr.bf16.mxu0 %v1420_v27  ;;  %1286 = vmatprep.subr.bf16.mxu1 %v1421_v28 }
  0x72   : > { %1265 = vmatpush3.bf16.msra.mxu0 %v1422_v29  ;;  %1287 = vmatpush3.bf16.msra.mxu1 %v1423_v30  ;;  %v1246_v29 = vld [vmem:[%s1787_s4] ss:$0 sm:$0xff] (!%p1245_p12) }
  0x73   : > { %1266 = vmatprep.subr.bf16.mxu0 %v1424_v31  ;;  %1288 = vmatprep.subr.bf16.mxu1 %v1425_v32 }
  0x76   : > { %1267 = vmatpush3.bf16.msra.mxu0 %v1426_v33  ;;  %1289 = vmatpush3.bf16.msra.mxu1 %v1427_v34 }
 0x12c   : > { %v638_v46 = vpop.f32.mrb[0].mxu0  ;;  %v681_v47 = vpop.f32.mrb[0].mxu1 }
 0x12d   : > { %v639_v48 = vadd.f32 %v638_v46, %v421_v42  ;;  %v682_v49 = vadd.f32 %v681_v47, %v429_v43  ;;  %v640_v50 = vpop.f32.mrb[1].mxu0  ;;  %v683_v51 = vpop.f32.mrb[1].mxu1 }
 0x12e   : > { %v641_v52 = vadd.f32 %v640_v50, %v425_v44  ;;  %v684_v53 = vadd.f32 %v683_v51, %v433_v45  ;;  %v642_v54 = vpop.f32.mrb[2].mxu0  ;;  %v685_v55 = vpop.f32.mrb[2].mxu1 }
 0x12f   : > { %v643_v56 = vadd.f32 %v642_v54, %v421_v42  ;;  %v686_v57 = vadd.f32 %v685_v55, %v429_v43  ;;  %v644_v58 = vpop.f32.mrb[3].mxu0  ;;  %v687_v59 = vpop.f32.mrb[3].mxu1  ;;  %v690_v62 = vmax.f32 %v639_v48, 0.0  ;;  %v692_v63 = vmax.f32 %v682_v49, 0.0 }
 0x130   : > { %v645_v60 = vadd.f32 %v644_v58, %v425_v44  ;;  %v688_v61 = vadd.f32 %v687_v59, %v433_v45  ;;  %v691_v2 = vmax.f32 %v641_v52, 0.0  ;;  %v693_v3 = vmax.f32 %v684_v53, 0.0 }
 0x131   : > { %v694_v0 = vmax.f32 %v643_v56, 0.0  ;;  %v696_v1 = vmax.f32 %v686_v57, 0.0 }
 0x132   : > { %v695_v4 = vmax.f32 %v645_v60, 0.0  ;;  %v697_v5 = vmax.f32 %v688_v61, 0.0 }
 0x133   : > { %v700_v6 = vpack.c.bf16 %v694_v0, %v690_v62  ;;  %v702_v7 = vpack.c.bf16 %v696_v1, %v692_v63 }
 0x134   : > { %v701_v8 = vpack.c.bf16 %v695_v4, %v691_v2  ;;  %v703_v9 = vpack.c.bf16 %v697_v5, %v693_v3 }
 0x136   : > { %992 = vmatprep.mubr.bf16.mxu0 %v701_v8  ;;  %1033 = vmatprep.mubr.bf16.mxu1 %v703_v9 }
 0x137   : > { %993 = vmatmul.mubr.bf16.vlgmr.msra.gmra.mrb[4].mxu0 %v700_v6  ;;  %1034 = vmatmul.mubr.bf16.vlgmr.msra.gmra.mrb[4].mxu1 %v702_v7 }
 0x20a   : > { %v1268_v10 = vpop.f32.mrb[4].mxu0  ;;  %v1290_v11 = vpop.f32.mrb[4].mxu1 }
 0x20b   : > { %v1269_v12 = vpop.f32.mrb[5].mxu0  ;;  %v1291_v13 = vpop.f32.mrb[5].mxu1 }
 0x20c   : > { %v1270_v14 = vadd.f32 %v1269_v12, %v1268_v10  ;;  %v1292_v15 = vadd.f32 %v1291_v13, %v1290_v11  ;;  %v1271_v16 = vpop.f32.mrb[6].mxu0  ;;  %v1293_v17 = vpop.f32.mrb[6].mxu1 }
 0x20d   : > { %v1272_v19 = vpop.f32.mrb[7].mxu0  ;;  %v1294_v20 = vpop.f32.mrb[7].mxu1 }
 0x20e   : > { %v1036_v21 = vadd.f32 %v1292_v15, %v1270_v14  ;;  %v1273_v22 = vadd.f32 %v1272_v19, %v1271_v16  ;;  %v1295_v23 = vadd.f32 %v1294_v20, %v1293_v17  ;;  %1049 = sbr.rel (%p1245_p12) target bundleno = 543 (0x21f), region = 71 }
 0x210   : > { %v1042_v25 = vadd.f32 %v1036_v21, %v698_v18  ;;  %v1039_v26 = vadd.f32 %v1295_v23, %v1273_v22 }
 0x212   : > { %1044 = vst [vmem:[#allocation2] sm:$0xff] %v1042_v25  ;;  %v1043_v27 = vadd.f32 %v1039_v26, %v699_v24 }
 0x214   : > { %1045 = vst [vmem:[#allocation2 + $0x8] sm:$0xff] %v1043_v27 }
 0x219   : > { %v1050_v28 = vld [vmem:[#allocation2] sm:$0xff] }
 0x21a   : > { %v1059_v31 = vadd.f32 %v1246_v29, %v1050_v28 }
 0x21b   : > { %v1051_v30 = vld [vmem:[#allocation2 + $0x8] sm:$0xff] }
 0x21c   : > { %v1060_v32 = vadd.f32 %v1246_v29, %v1051_v30  ;;  %1061 = vst [vmem:[#allocation4] sm:$0xff] %v1059_v31 }
 0x21e   : > { %1062 = vst [vmem:[#allocation4 + $0x8] sm:$0xff] %v1060_v32 }
 0x21f PF: > { %p1742_p13 = scmp.eq.s32.totalorder %s1167_s23, 1  ;;  %s1500_s20 = smov [#allocation4]  }
 0x220   : > { %s1072_s11 = sshll.u32 %s1500_s20, 4  ;;  %s1073_s11 = int_to_ptr.vmem [resolvable:$true] %s1072_s11 }
 0x221   : > { %s1428_s12 = scalar_lea.vmem %s1073_s11, 256  ;;  %p1435_p3 = scmp.lt.s32.totalorder %s1073_s11, %s1073_s11 }
 0x222   : > { %p1429_p0 = scmp.ne.s32.totalorder %s1073_s11, %s1428_s12  ;;  %p1436_p4 = scmp.lt.s32.totalorder %s1428_s12, %s1428_s12 }
 0x224   : > { %p1430_p1 = pnand %p1429_p0, %p1742_p13  ;;  %p1437_p5 = por %p1436_p4, %p1435_p3 }
 0x226   : > { %p1431_p2 = pneg %p1430_p1 }
 0x228   : > { %p1438_p6 = pnand %p1437_p5, %p1431_p2 }
 0x22a   : > { %1441 = shalt.err (!%p1438_p6)
}
 0x22b   : > { %s1442_s23 = scalar_lea.hbm %s1788_s5, 256 }
 0x22c   : > { %p1443_p7 = scmp.ne.s32.totalorder %s1788_s5, %s1442_s23  ;;  %p1448_p10 = scmp.lt.u32.totalorder %s1442_s23, %s1788_s5 }
 0x22e   : > { %p1444_p8 = pnand %p1443_p7, %p1742_p13 }
 0x230   : > { %p1445_p9 = pneg %p1444_p8 }
 0x232   : > { %p1450_p11 = pnand %p1448_p10, %p1445_p9 }
 0x234   : > { %1453 = shalt.err (!%p1450_p11)
}
 0x235   : > { %s1501_s26 = smov 128   ;;  %s1502_s28 = smov 8  }
 0x236   : > { %1297 = dma.vmem_to_hbm [thread:$0]  (%p1742_p13), %s1073_s11, 256, %s1788_s5, [#allocation5], %s1501_s26, %s1501_s26, %s1502_s28  }
 0x237   : > { %1475 = dma.done.wait (%p1742_p13), [#allocation5], 256  }
 0x238   : > { %1477 = vsyncadd (%p1742_p13), [#allocation5], 4294967040 }
 0x239 PF: > { %s16_s22 = sadd.s32 1, %s1496_s22   ;;  %s1790_s18 = smov %s1484_s19 }
 0x23a   : > { %p13_p12 = scmp.ge.s32.totalorder %s16_s22, 4   ;;  %s1791_s19 = smov %s1569_s27 }
 0x23b   : > { %s1792_s20 = smov %s1492_s21  ;;  %s1793_s21 = smov %s1795_s24 }
 0x23c   :  { %15 = sbr.rel (!%p13_p12) target bundleno = 3 (0x3), region = 113 }
 0x243   :  { %1088 = vsyncpa [#allocation5], 1 }
 0x244   :  { %1090 = vsyncpa [#allocation5 + $0x1], 1 }

</bundles_post_ra>
